<compile_context>
chip_gen: v5e
topology: v5e:2x2
jax: 0.10.0
libtpu: 0.0.40
codegen_flags: <defaults>
</compile_context>

<pallas_src>
import functools

import jax
import jax.numpy as jnp
from jax.experimental import pallas as pl
from jax.experimental.pallas import tpu as pltpu


LANE = 128


def _round_up(v, m=LANE):
    return ((v + m - 1) // m) * m


# ----------------------------------------------------------------------------
# Fused DilatedConvEncoder kernel
#   (depth+1 dilated convs  ->  1x1 projection  ->  max-pool over time)
# ----------------------------------------------------------------------------
def fused_encoder_kernel(x_ref, w0_ref, wr_ref, b_ref, wp_ref, bp_ref, o_ref,
                         *, n_layers, c_pad, out_dims):
    """Runs one batch element through the full encoder, entirely in VMEM.

    x_ref : (T, Cin)              input series (f32)
    w0_ref: (Cin, 3*C_pad)        layer-0 taps [left|center|right]   (f32)
    wr_ref: (L-1, C_pad, 3*C_pad) layer 1..L-1 taps                  (bf16)
    b_ref : (L, 1, C_pad)         conv biases                        (f32)
    wp_ref: (C_pad, O_pad)        1x1 projection                     (bf16)
    bp_ref: (1, O_pad)            projection bias                    (f32)
    o_ref : (1, 1, out_dims)      pooled representation              (f32)
    """
    T = x_ref.shape[0]

    def combine_taps(z, d):
        # z : (T, 3*C_pad) f32 = [x @ w_left | x @ w_center | x @ w_right]
        # y[t] = z_left[t-d] + z_center[t] + z_right[t+d]  (zeros out of range)
        z_l = z[:, :c_pad]
        z_c = z[:, c_pad:2 * c_pad]
        z_r = z[:, 2 * c_pad:]
        t_idx = jax.lax.broadcasted_iota(jnp.int32, (T, c_pad), 0)
        s = d % T
        left = jnp.where(t_idx >= d,
                         pltpu.roll(z_l, shift=s, axis=0), 0.0)
        right = jnp.where(t_idx < T - d,
                          pltpu.roll(z_r, shift=(T - s) % T, axis=0), 0.0)
        return z_c + left + right

    h = x_ref[...]                                  # (T, Cin); layer 0 in f32
    for layer in range(n_layers):
        w = w0_ref[...] if layer == 0 else wr_ref[layer - 1]
        z = jnp.dot(h, w, preferred_element_type=jnp.float32)  # (T, 3*C_pad)
        y = combine_taps(z, 2 ** layer) + b_ref[layer]
        if layer < n_layers - 1:
            y = jax.nn.gelu(y)
        h = y.astype(jnp.bfloat16)                  # bf16 operand for next MXU op

    p = jnp.dot(h, wp_ref[...], preferred_element_type=jnp.float32)
    p = p + bp_ref[...]
    pooled = jnp.max(p, axis=0, keepdims=True)      # (1, O_pad) max over time
    o_ref[...] = pooled[:, :out_dims].reshape(1, 1, out_dims)


def fused_encoder_apply(packed, x):
    """x : (B, T, Cin) f32  ->  (B, output_dims) f32."""
    B, T, cin = x.shape
    w0, wr, b_all, wp, bp = (packed["w0"], packed["wr"], packed["b"],
                             packed["wp"], packed["bp"])
    n_layers = b_all.shape[0]
    c_pad = w0.shape[1] // 3
    out_dims = packed["out_dims"]

    kern = functools.partial(fused_encoder_kernel, n_layers=n_layers,
                             c_pad=c_pad, out_dims=out_dims)
    out = pl.pallas_call(
        kern,
        out_shape=jax.ShapeDtypeStruct((B, 1, out_dims), jnp.float32),
        grid_spec=pltpu.PrefetchScalarGridSpec(
            num_scalar_prefetch=0,
            grid=(B,),                                        # one series/step
            in_specs=[
                pl.BlockSpec((None, T, cin), lambda b: (b, 0, 0)),
                pl.BlockSpec(w0.shape, lambda b: (0, 0)),         # resident
                pl.BlockSpec(wr.shape, lambda b: (0, 0, 0)),      # resident
                pl.BlockSpec(b_all.shape, lambda b: (0, 0, 0)),   # resident
                pl.BlockSpec(wp.shape, lambda b: (0, 0)),         # resident
                pl.BlockSpec(bp.shape, lambda b: (0, 0)),         # resident
            ],
            out_specs=pl.BlockSpec((1, 1, out_dims), lambda b: (b, 0, 0)),
        ),
        compiler_params=pltpu.CompilerParams(
            dimension_semantics=("parallel",),   # megacore / dual-TC sharding
            vmem_limit_bytes=48 * 1024 * 1024,   # sized against v7x 64 MiB VMEM
        ),
    )(x, w0, wr, b_all, wp, bp)
    return out.reshape(B, out_dims)


# ----------------------------------------------------------------------------
# Normalize + euclidean distance + logits kernel
# ----------------------------------------------------------------------------
def euclid_logits_kernel(r_ref, c_ref, logits_ref, rn_ref, *, tau, eps_pd, eps_norm):
    """L2-normalize class representation and cores, logits = (1/dist)/tau.

    r_ref : (B, D) raw class representation   c_ref : (K, D) cores
    logits_ref : (B, K)                        rn_ref : (B, D) normalized repr
    """
    r = r_ref[...]
    c = c_ref[...]
    rn = r / jnp.maximum(jnp.sqrt(jnp.sum(r * r, axis=1, keepdims=True)), eps_norm)
    cn = c / jnp.maximum(jnp.sqrt(jnp.sum(c * c, axis=1, keepdims=True)), eps_norm)
    K = c_ref.shape[0]
    cols = []
    for k in range(K):                       # K = classes, small static constant
        diff = rn - cn[k:k + 1, :] + eps_pd  # matches torch pairwise_distance eps
        cols.append(jnp.sum(diff * diff, axis=1, keepdims=True))
    d2 = jnp.concatenate(cols, axis=1)                        # (B, K) squared
    logits_ref[...] = jax.lax.rsqrt(d2) * (1.0 / tau)         # 1/dist/tau (EUP)
    rn_ref[...] = rn


def _vmem_spec():
    return pl.BlockSpec(memory_space=pltpu.MemorySpace.VMEM)


def euclid_logits(class_repr_raw, cores, tau):
    B, D = class_repr_raw.shape
    K = cores.shape[0]
    kern = functools.partial(euclid_logits_kernel, tau=tau, eps_pd=1e-6,
                             eps_norm=1e-12)
    return pl.pallas_call(
        kern,
        out_shape=(jax.ShapeDtypeStruct((B, K), jnp.float32),
                   jax.ShapeDtypeStruct((B, D), jnp.float32)),
        in_specs=[_vmem_spec(), _vmem_spec()],
        out_specs=(_vmem_spec(), _vmem_spec()),
    )(class_repr_raw, cores)


# ----------------------------------------------------------------------------
# Parameter init (PyTorch-matching distributions) + kernel-ready packing
# ----------------------------------------------------------------------------
def init_dilated_conv_encoder(key, input_dims, hidden_dims, depth, reduced_dims,
                              output_dims):
    """Init one DilatedConvEncoder and pack it into padded, bf16 kernel blocks."""
    channels = [hidden_dims] * depth + [reduced_dims]
    n_layers = len(channels)
    c_pad = _round_up(max(channels))
    o_pad = _round_up(output_dims)

    w0 = jnp.zeros((input_dims, 3 * c_pad), jnp.float32)
    wr = jnp.zeros((max(n_layers - 1, 1), c_pad, 3 * c_pad), jnp.float32)
    b_all = jnp.zeros((n_layers, 1, c_pad), jnp.float32)

    in_c = input_dims
    for l, out_c in enumerate(channels):
        key, k1, k2 = jax.random.split(key, 3)
        bound = 1.0 / jnp.sqrt(3.0 * in_c)          # PyTorch Conv1d default init
        w = jax.random.uniform(k1, (3, in_c, out_c), jnp.float32, -bound, bound)
        b = jax.random.uniform(k2, (out_c,), jnp.float32, -bound, bound)
        for tap in range(3):
            lo = tap * c_pad
            if l == 0:
                w0 = w0.at[:, lo:lo + out_c].set(w[tap])
            else:
                wr = wr.at[l - 1, :in_c, lo:lo + out_c].set(w[tap])
        b_all = b_all.at[l, 0, :out_c].set(b)
        in_c = out_c

    key, k1, k2 = jax.random.split(key, 3)
    bound = 1.0 / jnp.sqrt(float(in_c))
    wp = jnp.zeros((c_pad, o_pad), jnp.float32)
    wp = wp.at[:in_c, :output_dims].set(
        jax.random.uniform(k1, (in_c, output_dims), jnp.float32, -bound, bound))
    bp = jnp.zeros((1, o_pad), jnp.float32)
    bp = bp.at[0, :output_dims].set(
        jax.random.uniform(k2, (output_dims,), jnp.float32, -bound, bound))

    return {
        "w0": w0,                        # f32 (layer-0 contraction dim is tiny)
        "wr": wr.astype(jnp.bfloat16),   # bf16 MXU operands, packed once
        "b": b_all,                      # f32 (bias / GELU stay f32 on VPU)
        "wp": wp.astype(jnp.bfloat16),
        "bp": bp,
        "out_dims": output_dims,
    }


def init_ours_encoder(key, *, input_dims, output_dims, reduced_dims, hidden_dims,
                      depth, classes):
    keys = jax.random.split(key, classes + 2)
    class_encoder = init_dilated_conv_encoder(
        keys[0], input_dims, hidden_dims, depth, reduced_dims, output_dims)
    encoder_list = [
        init_dilated_conv_encoder(keys[1 + k], input_dims, hidden_dims, depth,
                                  reduced_dims, output_dims)
        for k in range(classes)
    ]
    # cores: xavier_uniform with gain = calculate_gain('leaky_relu')
    gain = (2.0 / (1.0 + 0.01 ** 2)) ** 0.5
    bound = gain * (6.0 / (classes + output_dims)) ** 0.5
    cores = jax.random.uniform(keys[-1], (classes, output_dims), jnp.float32,
                               -bound, bound)
    return {"class_encoder": class_encoder, "encoder_list": encoder_list,
            "cores": cores}


# ----------------------------------------------------------------------------
# Forward
# ----------------------------------------------------------------------------
def ours_encoder_forward(params, x, only_class=False, tau=0.1):
    """x : (B, T, input_dims) channels-last."""
    B = x.shape[0]
    classes, output_dims = params["cores"].shape

    class_repr_raw = fused_encoder_apply(params["class_encoder"], x)
    cates_logits, class_repr = euclid_logits(class_repr_raw, params["cores"], tau)

    # cate_fun == 'argmax'. torch's `cates[:, arg] = 1.0` with a vector `arg`
    # sets, in EVERY row, the columns appearing anywhere in `arg` — we keep
    # that column-set semantics faithfully.
    arg = jnp.argmax(cates_logits, axis=-1)                       # (B,)
    col_active = jnp.zeros((classes,), jnp.float32).at[arg].set(1.0)
    cates = jnp.broadcast_to(col_active[None, :], (B, classes))

    representation = jnp.zeros((B, output_dims), jnp.float32)
    if not only_class:
        for k in range(classes):
            # Runtime-skip inactive class encoders (their weight is exactly 0
            # or 1 under the column-set cates) instead of scaling by zero.
            rep_k = jax.lax.cond(
                col_active[k] > 0.001,
                functools.partial(fused_encoder_apply,
                                  params["encoder_list"][k], x),
                lambda: jnp.zeros((B, output_dims), jnp.float32),
            )
            representation = representation + rep_k
    return {"cates": cates, "repr": representation, "class_repr": class_repr}


# ----------------------------------------------------------------------------
# Pure-JAX reference of the fused encoder (for the in-script self-check)
# ----------------------------------------------------------------------------
def encoder_reference(packed, x):
    T = x.shape[1]
    c_pad = packed["w0"].shape[1] // 3
    n_layers = packed["b"].shape[0]
    h = x.astype(jnp.float32)
    for l in range(n_layers):
        w = (packed["w0"] if l == 0 else packed["wr"][l - 1]).astype(jnp.float32)
        d = 2 ** l
        z = jnp.einsum("btc,cf->btf", h, w)
        z_l, z_c, z_r = z[..., :c_pad], z[..., c_pad:2 * c_pad], z[..., 2 * c_pad:]
        left = jnp.pad(z_l, ((0, 0), (d, 0), (0, 0)))[:, :T]
        right = jnp.pad(z_r, ((0, 0), (0, d), (0, 0)))[:, d:d + T]
        y = left + z_c + right + packed["b"][l]
        if l < n_layers - 1:
            y = jax.nn.gelu(y)
        h = y
    p = jnp.einsum("btc,co->bto", h, packed["wp"].astype(jnp.float32)) + packed["bp"]
    return jnp.max(p, axis=1)[:, :packed["out_dims"]]


# ----------------------------------------------------------------------------
if __name__ == "__main__":
    # Small, module-consistent shapes.
    B, T = 2, 16
    input_dims, hidden_dims, depth = 4, 8, 3
    reduced_dims, output_dims, classes = 16, 32, 3

    key = jax.random.PRNGKey(0)
    k_params, k_x = jax.random.split(key)
    params = init_ours_encoder(
        k_params,
        input_dims=input_dims, output_dims=output_dims, reduced_dims=reduced_dims,
        hidden_dims=hidden_dims, depth=depth, classes=classes)

    x = jax.random.normal(k_x, (B, T, input_dims), jnp.float32)

    out = ours_encoder_forward(params, x)
    out = jax.block_until_ready(out)

    assert out["cates"].shape == (B, classes)
    assert out["repr"].shape == (B, output_dims)
    assert out["class_repr"].shape == (B, output_dims)
    assert bool(jnp.all(jnp.isfinite(out["repr"])))
    assert bool(jnp.all(jnp.isfinite(out["class_repr"])))

    # Numerical self-check of the fused Pallas encoder against the pure-JAX
    # reference (same packed weights; only bf16 matmul rounding differs).
    got = fused_encoder_apply(params["class_encoder"], x)
    want = encoder_reference(params["class_encoder"], x)
    got, want = jax.block_until_ready((got, want))
    max_err = float(jnp.max(jnp.abs(got - want)))
    assert max_err < 1e-1, f"fused encoder mismatch: max|diff|={max_err}"

    print("KERNEL_OK")
</pallas_src>

<mosaic_0001>
module attributes {stable_mosaic.version = 11 : i64} {
  func.func @fused_encoder_kernel(%arg0: i32, %arg1: memref<1x16x4xf32, #tpu.memory_space<vmem>>, %arg2: memref<4x384xf32, #tpu.memory_space<vmem>>, %arg3: memref<3x128x384xbf16, #tpu.memory_space<vmem>>, %arg4: memref<4x1x128xf32, #tpu.memory_space<vmem>>, %arg5: memref<128x128xbf16, #tpu.memory_space<vmem>>, %arg6: memref<1x128xf32, #tpu.memory_space<vmem>>, %arg7: memref<1x1x32xf32, #tpu.memory_space<vmem>>) attributes {dimension_semantics = [#tpu.dimension_semantics<parallel>], iteration_bounds = array<i64: 2>, scalar_prefetch = 0 : i64, scratch_operands = 0 : i64, tpu.core_type = #tpu.core_type<tc>, window_params = [{transform_indices = @transform_0, window_bounds = array<i64: 1, 16, 4>}, {pipeline_mode = #tpu.pipeline_mode<synchronous>, transform_indices = @transform_1, window_bounds = array<i64: 4, 384>}, {pipeline_mode = #tpu.pipeline_mode<synchronous>, transform_indices = @transform_2, window_bounds = array<i64: 3, 128, 384>}, {pipeline_mode = #tpu.pipeline_mode<synchronous>, transform_indices = @transform_3, window_bounds = array<i64: 4, 1, 128>}, {pipeline_mode = #tpu.pipeline_mode<synchronous>, transform_indices = @transform_4, window_bounds = array<i64: 128, 128>}, {pipeline_mode = #tpu.pipeline_mode<synchronous>, transform_indices = @transform_5, window_bounds = array<i64: 1, 128>}, {transform_indices = @transform_6, window_bounds = array<i64: 1, 1, 32>}]} {
    %c0 = arith.constant 0 : index
    %c0_0 = arith.constant 0 : index
    %c0_1 = arith.constant 0 : index
    %0 = vector.load %arg1[%c0, %c0_0, %c0_1] : memref<1x16x4xf32, #tpu.memory_space<vmem>>, vector<1x16x4xf32>
    %1 = vector.shape_cast %0 : vector<1x16x4xf32> to vector<16x4xf32>
    %c0_2 = arith.constant 0 : index
    %c0_3 = arith.constant 0 : index
    %2 = vector.load %arg2[%c0_2, %c0_3] : memref<4x384xf32, #tpu.memory_space<vmem>>, vector<4x384xf32>
    %cst = arith.constant dense<0.000000e+00> : vector<16x384xf32>
    %3 = tpu.matmul %1, %2, %cst {dimension_numbers = #tpu.dot_dimension_numbers<[1], [0], [0], [1], [0, 0, 1, 1], [], []>} : vector<16x4xf32>, vector<4x384xf32>, vector<16x384xf32> -> vector<16x384xf32>
    %4 = vector.extract_strided_slice %3 {offsets = [0, 0], sizes = [16, 128], strides = [1, 1]} : vector<16x384xf32> to vector<16x128xf32>
    %5 = vector.extract_strided_slice %3 {offsets = [0, 128], sizes = [16, 128], strides = [1, 1]} : vector<16x384xf32> to vector<16x128xf32>
    %6 = vector.extract_strided_slice %3 {offsets = [0, 256], sizes = [16, 128], strides = [1, 1]} : vector<16x384xf32> to vector<16x128xf32>
    %7 = tpu.iota {dimensions = array<i32: 0>} : vector<16x128xi32>
    %c1_i32 = arith.constant 1 : i32
    %8 = vector.broadcast %c1_i32 : i32 to vector<16x128xi32>
    %9 = arith.cmpi sge, %7, %8 : vector<16x128xi32>
    %c1_i32_4 = arith.constant 1 : i32
    %10 = tpu.dynamic_rotate %4 by %c1_i32_4 dim 0 : vector<16x128xf32>, i32 -> vector<16x128xf32>
    %cst_5 = arith.constant 0.000000e+00 : f32
    %11 = vector.broadcast %cst_5 : f32 to vector<16x128xf32>
    %12 = arith.select %9, %10, %11 : vector<16x128xi1>, vector<16x128xf32>
    %c15_i32 = arith.constant 15 : i32
    %13 = vector.broadcast %c15_i32 : i32 to vector<16x128xi32>
    %14 = arith.cmpi slt, %7, %13 : vector<16x128xi32>
    %c15_i32_6 = arith.constant 15 : i32
    %15 = tpu.dynamic_rotate %6 by %c15_i32_6 dim 0 : vector<16x128xf32>, i32 -> vector<16x128xf32>
    %cst_7 = arith.constant 0.000000e+00 : f32
    %16 = vector.broadcast %cst_7 : f32 to vector<16x128xf32>
    %17 = arith.select %14, %15, %16 : vector<16x128xi1>, vector<16x128xf32>
    %18 = arith.addf %5, %12 : vector<16x128xf32>
    %19 = arith.addf %18, %17 : vector<16x128xf32>
    %c0_8 = arith.constant 0 : index
    %c0_9 = arith.constant 0 : index
    %c0_10 = arith.constant 0 : index
    %20 = vector.load %arg4[%c0_8, %c0_9, %c0_10] : memref<4x1x128xf32, #tpu.memory_space<vmem>>, vector<1x1x128xf32>
    %21 = vector.shape_cast %20 : vector<1x1x128xf32> to vector<1x128xf32>
    %22 = vector.broadcast %21 : vector<1x128xf32> to vector<16x128xf32>
    %23 = arith.addf %19, %22 : vector<16x128xf32>
    %24 = arith.mulf %23, %23 : vector<16x128xf32>
    %25 = arith.mulf %23, %24 : vector<16x128xf32>
    %cst_11 = arith.constant 4.471500e-02 : f32
    %26 = vector.broadcast %cst_11 : f32 to vector<16x128xf32>
    %27 = arith.mulf %26, %25 : vector<16x128xf32>
    %28 = arith.addf %23, %27 : vector<16x128xf32>
    %cst_12 = arith.constant 0.797884583 : f32
    %29 = vector.broadcast %cst_12 : f32 to vector<16x128xf32>
    %30 = arith.mulf %29, %28 : vector<16x128xf32>
    %31 = math.tanh %30 : vector<16x128xf32>
    %cst_13 = arith.constant 1.000000e+00 : f32
    %32 = vector.broadcast %cst_13 : f32 to vector<16x128xf32>
    %33 = arith.addf %32, %31 : vector<16x128xf32>
    %cst_14 = arith.constant 5.000000e-01 : f32
    %34 = vector.broadcast %cst_14 : f32 to vector<16x128xf32>
    %35 = arith.mulf %34, %33 : vector<16x128xf32>
    %36 = arith.mulf %23, %35 : vector<16x128xf32>
    %37 = arith.truncf %36 : vector<16x128xf32> to vector<16x128xbf16>
    %c0_15 = arith.constant 0 : index
    %c0_16 = arith.constant 0 : index
    %c0_17 = arith.constant 0 : index
    %38 = vector.load %arg3[%c0_15, %c0_16, %c0_17] : memref<3x128x384xbf16, #tpu.memory_space<vmem>>, vector<1x128x384xbf16>
    %39 = vector.shape_cast %38 : vector<1x128x384xbf16> to vector<128x384xbf16>
    %cst_18 = arith.constant dense<0.000000e+00> : vector<16x384xf32>
    %40 = tpu.matmul %37, %39, %cst_18 {dimension_numbers = #tpu.dot_dimension_numbers<[1], [0], [0], [1], [0, 0, 1, 1], [], []>} : vector<16x128xbf16>, vector<128x384xbf16>, vector<16x384xf32> -> vector<16x384xf32>
    %41 = vector.extract_strided_slice %40 {offsets = [0, 0], sizes = [16, 128], strides = [1, 1]} : vector<16x384xf32> to vector<16x128xf32>
    %42 = vector.extract_strided_slice %40 {offsets = [0, 128], sizes = [16, 128], strides = [1, 1]} : vector<16x384xf32> to vector<16x128xf32>
    %43 = vector.extract_strided_slice %40 {offsets = [0, 256], sizes = [16, 128], strides = [1, 1]} : vector<16x384xf32> to vector<16x128xf32>
    %44 = tpu.iota {dimensions = array<i32: 0>} : vector<16x128xi32>
    %c2_i32 = arith.constant 2 : i32
    %45 = vector.broadcast %c2_i32 : i32 to vector<16x128xi32>
    %46 = arith.cmpi sge, %44, %45 : vector<16x128xi32>
    %c2_i32_19 = arith.constant 2 : i32
    %47 = tpu.dynamic_rotate %41 by %c2_i32_19 dim 0 : vector<16x128xf32>, i32 -> vector<16x128xf32>
    %cst_20 = arith.constant 0.000000e+00 : f32
    %48 = vector.broadcast %cst_20 : f32 to vector<16x128xf32>
    %49 = arith.select %46, %47, %48 : vector<16x128xi1>, vector<16x128xf32>
    %c14_i32 = arith.constant 14 : i32
    %50 = vector.broadcast %c14_i32 : i32 to vector<16x128xi32>
    %51 = arith.cmpi slt, %44, %50 : vector<16x128xi32>
    %c14_i32_21 = arith.constant 14 : i32
    %52 = tpu.dynamic_rotate %43 by %c14_i32_21 dim 0 : vector<16x128xf32>, i32 -> vector<16x128xf32>
    %cst_22 = arith.constant 0.000000e+00 : f32
    %53 = vector.broadcast %cst_22 : f32 to vector<16x128xf32>
    %54 = arith.select %51, %52, %53 : vector<16x128xi1>, vector<16x128xf32>
    %55 = arith.addf %42, %49 : vector<16x128xf32>
    %56 = arith.addf %55, %54 : vector<16x128xf32>
    %c1 = arith.constant 1 : index
    %c0_23 = arith.constant 0 : index
    %c0_24 = arith.constant 0 : index
    %57 = vector.load %arg4[%c1, %c0_23, %c0_24] : memref<4x1x128xf32, #tpu.memory_space<vmem>>, vector<1x1x128xf32>
    %58 = vector.shape_cast %57 : vector<1x1x128xf32> to vector<1x128xf32>
    %59 = vector.broadcast %58 : vector<1x128xf32> to vector<16x128xf32>
    %60 = arith.addf %56, %59 : vector<16x128xf32>
    %61 = arith.mulf %60, %60 : vector<16x128xf32>
    %62 = arith.mulf %60, %61 : vector<16x128xf32>
    %cst_25 = arith.constant 4.471500e-02 : f32
    %63 = vector.broadcast %cst_25 : f32 to vector<16x128xf32>
    %64 = arith.mulf %63, %62 : vector<16x128xf32>
    %65 = arith.addf %60, %64 : vector<16x128xf32>
    %cst_26 = arith.constant 0.797884583 : f32
    %66 = vector.broadcast %cst_26 : f32 to vector<16x128xf32>
    %67 = arith.mulf %66, %65 : vector<16x128xf32>
    %68 = math.tanh %67 : vector<16x128xf32>
    %cst_27 = arith.constant 1.000000e+00 : f32
    %69 = vector.broadcast %cst_27 : f32 to vector<16x128xf32>
    %70 = arith.addf %69, %68 : vector<16x128xf32>
    %cst_28 = arith.constant 5.000000e-01 : f32
    %71 = vector.broadcast %cst_28 : f32 to vector<16x128xf32>
    %72 = arith.mulf %71, %70 : vector<16x128xf32>
    %73 = arith.mulf %60, %72 : vector<16x128xf32>
    %74 = arith.truncf %73 : vector<16x128xf32> to vector<16x128xbf16>
    %c1_29 = arith.constant 1 : index
    %c0_30 = arith.constant 0 : index
    %c0_31 = arith.constant 0 : index
    %75 = vector.load %arg3[%c1_29, %c0_30, %c0_31] : memref<3x128x384xbf16, #tpu.memory_space<vmem>>, vector<1x128x384xbf16>
    %76 = vector.shape_cast %75 : vector<1x128x384xbf16> to vector<128x384xbf16>
    %cst_32 = arith.constant dense<0.000000e+00> : vector<16x384xf32>
    %77 = tpu.matmul %74, %76, %cst_32 {dimension_numbers = #tpu.dot_dimension_numbers<[1], [0], [0], [1], [0, 0, 1, 1], [], []>} : vector<16x128xbf16>, vector<128x384xbf16>, vector<16x384xf32> -> vector<16x384xf32>
    %78 = vector.extract_strided_slice %77 {offsets = [0, 0], sizes = [16, 128], strides = [1, 1]} : vector<16x384xf32> to vector<16x128xf32>
    %79 = vector.extract_strided_slice %77 {offsets = [0, 128], sizes = [16, 128], strides = [1, 1]} : vector<16x384xf32> to vector<16x128xf32>
    %80 = vector.extract_strided_slice %77 {offsets = [0, 256], sizes = [16, 128], strides = [1, 1]} : vector<16x384xf32> to vector<16x128xf32>
    %81 = tpu.iota {dimensions = array<i32: 0>} : vector<16x128xi32>
    %c4_i32 = arith.constant 4 : i32
    %82 = vector.broadcast %c4_i32 : i32 to vector<16x128xi32>
    %83 = arith.cmpi sge, %81, %82 : vector<16x128xi32>
    %c4_i32_33 = arith.constant 4 : i32
    %84 = tpu.dynamic_rotate %78 by %c4_i32_33 dim 0 : vector<16x128xf32>, i32 -> vector<16x128xf32>
    %cst_34 = arith.constant 0.000000e+00 : f32
    %85 = vector.broadcast %cst_34 : f32 to vector<16x128xf32>
    %86 = arith.select %83, %84, %85 : vector<16x128xi1>, vector<16x128xf32>
    %c12_i32 = arith.constant 12 : i32
    %87 = vector.broadcast %c12_i32 : i32 to vector<16x128xi32>
    %88 = arith.cmpi slt, %81, %87 : vector<16x128xi32>
    %c12_i32_35 = arith.constant 12 : i32
    %89 = tpu.dynamic_rotate %80 by %c12_i32_35 dim 0 : vector<16x128xf32>, i32 -> vector<16x128xf32>
    %cst_36 = arith.constant 0.000000e+00 : f32
    %90 = vector.broadcast %cst_36 : f32 to vector<16x128xf32>
    %91 = arith.select %88, %89, %90 : vector<16x128xi1>, vector<16x128xf32>
    %92 = arith.addf %79, %86 : vector<16x128xf32>
    %93 = arith.addf %92, %91 : vector<16x128xf32>
    %c2 = arith.constant 2 : index
    %c0_37 = arith.constant 0 : index
    %c0_38 = arith.constant 0 : index
    %94 = vector.load %arg4[%c2, %c0_37, %c0_38] : memref<4x1x128xf32, #tpu.memory_space<vmem>>, vector<1x1x128xf32>
    %95 = vector.shape_cast %94 : vector<1x1x128xf32> to vector<1x128xf32>
    %96 = vector.broadcast %95 : vector<1x128xf32> to vector<16x128xf32>
    %97 = arith.addf %93, %96 : vector<16x128xf32>
    %98 = arith.mulf %97, %97 : vector<16x128xf32>
    %99 = arith.mulf %97, %98 : vector<16x128xf32>
    %cst_39 = arith.constant 4.471500e-02 : f32
    %100 = vector.broadcast %cst_39 : f32 to vector<16x128xf32>
    %101 = arith.mulf %100, %99 : vector<16x128xf32>
    %102 = arith.addf %97, %101 : vector<16x128xf32>
    %cst_40 = arith.constant 0.797884583 : f32
    %103 = vector.broadcast %cst_40 : f32 to vector<16x128xf32>
    %104 = arith.mulf %103, %102 : vector<16x128xf32>
    %105 = math.tanh %104 : vector<16x128xf32>
    %cst_41 = arith.constant 1.000000e+00 : f32
    %106 = vector.broadcast %cst_41 : f32 to vector<16x128xf32>
    %107 = arith.addf %106, %105 : vector<16x128xf32>
    %cst_42 = arith.constant 5.000000e-01 : f32
    %108 = vector.broadcast %cst_42 : f32 to vector<16x128xf32>
    %109 = arith.mulf %108, %107 : vector<16x128xf32>
    %110 = arith.mulf %97, %109 : vector<16x128xf32>
    %111 = arith.truncf %110 : vector<16x128xf32> to vector<16x128xbf16>
    %c2_43 = arith.constant 2 : index
    %c0_44 = arith.constant 0 : index
    %c0_45 = arith.constant 0 : index
    %112 = vector.load %arg3[%c2_43, %c0_44, %c0_45] : memref<3x128x384xbf16, #tpu.memory_space<vmem>>, vector<1x128x384xbf16>
    %113 = vector.shape_cast %112 : vector<1x128x384xbf16> to vector<128x384xbf16>
    %cst_46 = arith.constant dense<0.000000e+00> : vector<16x384xf32>
    %114 = tpu.matmul %111, %113, %cst_46 {dimension_numbers = #tpu.dot_dimension_numbers<[1], [0], [0], [1], [0, 0, 1, 1], [], []>} : vector<16x128xbf16>, vector<128x384xbf16>, vector<16x384xf32> -> vector<16x384xf32>
    %115 = vector.extract_strided_slice %114 {offsets = [0, 0], sizes = [16, 128], strides = [1, 1]} : vector<16x384xf32> to vector<16x128xf32>
    %116 = vector.extract_strided_slice %114 {offsets = [0, 128], sizes = [16, 128], strides = [1, 1]} : vector<16x384xf32> to vector<16x128xf32>
    %117 = vector.extract_strided_slice %114 {offsets = [0, 256], sizes = [16, 128], strides = [1, 1]} : vector<16x384xf32> to vector<16x128xf32>
    %118 = tpu.iota {dimensions = array<i32: 0>} : vector<16x128xi32>
    %c8_i32 = arith.constant 8 : i32
    %119 = vector.broadcast %c8_i32 : i32 to vector<16x128xi32>
    %120 = arith.cmpi sge, %118, %119 : vector<16x128xi32>
    %c8_i32_47 = arith.constant 8 : i32
    %121 = tpu.dynamic_rotate %115 by %c8_i32_47 dim 0 : vector<16x128xf32>, i32 -> vector<16x128xf32>
    %cst_48 = arith.constant 0.000000e+00 : f32
    %122 = vector.broadcast %cst_48 : f32 to vector<16x128xf32>
    %123 = arith.select %120, %121, %122 : vector<16x128xi1>, vector<16x128xf32>
    %c8_i32_49 = arith.constant 8 : i32
    %124 = vector.broadcast %c8_i32_49 : i32 to vector<16x128xi32>
    %125 = arith.cmpi slt, %118, %124 : vector<16x128xi32>
    %c8_i32_50 = arith.constant 8 : i32
    %126 = tpu.dynamic_rotate %117 by %c8_i32_50 dim 0 : vector<16x128xf32>, i32 -> vector<16x128xf32>
    %cst_51 = arith.constant 0.000000e+00 : f32
    %127 = vector.broadcast %cst_51 : f32 to vector<16x128xf32>
    %128 = arith.select %125, %126, %127 : vector<16x128xi1>, vector<16x128xf32>
    %129 = arith.addf %116, %123 : vector<16x128xf32>
    %130 = arith.addf %129, %128 : vector<16x128xf32>
    %c3 = arith.constant 3 : index
    %c0_52 = arith.constant 0 : index
    %c0_53 = arith.constant 0 : index
    %131 = vector.load %arg4[%c3, %c0_52, %c0_53] : memref<4x1x128xf32, #tpu.memory_space<vmem>>, vector<1x1x128xf32>
    %132 = vector.shape_cast %131 : vector<1x1x128xf32> to vector<1x128xf32>
    %133 = vector.broadcast %132 : vector<1x128xf32> to vector<16x128xf32>
    %134 = arith.addf %130, %133 : vector<16x128xf32>
    %135 = arith.truncf %134 : vector<16x128xf32> to vector<16x128xbf16>
    %c0_54 = arith.constant 0 : index
    %c0_55 = arith.constant 0 : index
    %136 = vector.load %arg5[%c0_54, %c0_55] : memref<128x128xbf16, #tpu.memory_space<vmem>>, vector<128x128xbf16>
    %cst_56 = arith.constant dense<0.000000e+00> : vector<16x128xf32>
    %137 = tpu.matmul %135, %136, %cst_56 {dimension_numbers = #tpu.dot_dimension_numbers<[1], [0], [0], [1], [0, 0, 1, 1], [], []>} : vector<16x128xbf16>, vector<128x128xbf16>, vector<16x128xf32> -> vector<16x128xf32>
    %c0_57 = arith.constant 0 : index
    %c0_58 = arith.constant 0 : index
    %138 = vector.load %arg6[%c0_57, %c0_58] : memref<1x128xf32, #tpu.memory_space<vmem>>, vector<1x128xf32>
    %139 = vector.broadcast %138 : vector<1x128xf32> to vector<16x128xf32>
    %140 = arith.addf %137, %139 : vector<16x128xf32>
    %cst_59 = arith.constant dense<0xFF800000> : vector<128xf32>
    %141 = vector.multi_reduction <maximumf>, %140, %cst_59 [0] : vector<16x128xf32> to vector<128xf32>
    %142 = vector.shape_cast %141 : vector<128xf32> to vector<1x128xf32>
    %143 = vector.extract_strided_slice %142 {offsets = [0, 0], sizes = [1, 32], strides = [1, 1]} : vector<1x128xf32> to vector<1x32xf32>
    %144 = vector.shape_cast %143 : vector<1x32xf32> to vector<1x1x32xf32>
    %c0_60 = arith.constant 0 : index
    %c0_61 = arith.constant 0 : index
    %c0_62 = arith.constant 0 : index
    %145 = vector.load %arg7[%c0_60, %c0_61, %c0_62] : memref<1x1x32xf32, #tpu.memory_space<vmem>>, vector<1x1x32xf32>
    tpu.vector_store %arg7[%c0_60, %c0_61, %c0_62], %144 {strides = array<i32>} : memref<1x1x32xf32, #tpu.memory_space<vmem>>, vector<1x1x32xf32>,
    return
  }
  func.func @transform_0(%arg0: i32) -> (i32, i32, i32) {
    %c0_i32 = arith.constant 0 : i32
    %c0_i32_0 = arith.constant 0 : i32
    %c0_i32_1 = arith.constant 0 : i32
    return %arg0, %c0_i32, %c0_i32_0 : i32, i32, i32
  }
  func.func @transform_1(%arg0: i32) -> (i32, i32) {
    %c0_i32 = arith.constant 0 : i32
    %c0_i32_0 = arith.constant 0 : i32
    %c0_i32_1 = arith.constant 0 : i32
    return %c0_i32, %c0_i32_0 : i32, i32
  }
  func.func @transform_2(%arg0: i32) -> (i32, i32, i32) {
    %c0_i32 = arith.constant 0 : i32
    %c0_i32_0 = arith.constant 0 : i32
    %c0_i32_1 = arith.constant 0 : i32
    %c0_i32_2 = arith.constant 0 : i32
    return %c0_i32, %c0_i32_0, %c0_i32_1 : i32, i32, i32
  }
  func.func @transform_3(%arg0: i32) -> (i32, i32, i32) {
    %c0_i32 = arith.constant 0 : i32
    %c0_i32_0 = arith.constant 0 : i32
    %c0_i32_1 = arith.constant 0 : i32
    %c0_i32_2 = arith.constant 0 : i32
    return %c0_i32, %c0_i32_0, %c0_i32_1 : i32, i32, i32
  }
  func.func @transform_4(%arg0: i32) -> (i32, i32) {
    %c0_i32 = arith.constant 0 : i32
    %c0_i32_0 = arith.constant 0 : i32
    %c0_i32_1 = arith.constant 0 : i32
    return %c0_i32, %c0_i32_0 : i32, i32
  }
  func.func @transform_5(%arg0: i32) -> (i32, i32) {
    %c0_i32 = arith.constant 0 : i32
    %c0_i32_0 = arith.constant 0 : i32
    %c0_i32_1 = arith.constant 0 : i32
    return %c0_i32, %c0_i32_0 : i32, i32
  }
  func.func @transform_6(%arg0: i32) -> (i32, i32, i32) {
    %c0_i32 = arith.constant 0 : i32
    %c0_i32_0 = arith.constant 0 : i32
    %c0_i32_1 = arith.constant 0 : i32
    return %arg0, %c0_i32, %c0_i32_0 : i32, i32, i32
  }
}

</mosaic_0001>

<bundles_post_ra>
// kernel: tpu_custom_call.1
= control target key start
LH: loop header
LB: loop body
LE: loop exit
PB: predicated region body
PF: predicated region fallthrough
CT: control target
= control target key end

     0   :  { %11 = vsyncpa [#allocation3], 0  ;;  %s2192_s0 = inlined_call_operand.vmem [shape: f32[2,16,4], index: 0, kind: input, shape index: {}]   ;;  %s2193_s1 = inlined_call_operand.vmem [shape: f32[4,384], index: 1, kind: input, shape index: {}]   ;;  %s2194_s2 = inlined_call_operand.hbm [shape: bf16[3,128,384], index: 2, kind: input, shape index: {}]   ;;  %s2195_s3 = inlined_call_operand.vmem [shape: f32[4,1,128], index: 3, kind: input, shape index: {}]   ;;  %s2196_s4 = inlined_call_operand.hbm [shape: bf16[128,128], index: 4, kind: input, shape index: {}]   ;;  %s2197_s5 = inlined_call_operand.vmem [shape: f32[1,128], index: 5, kind: input, shape index: {}]   ;;  %s2198_s6 = inlined_call_operand.hbm [shape: f32[2,1,32], index: 6, kind: output, shape index: {}]  }
   0x1   :  { %12 = vsyncpa [#allocation6], 0 }
   0x2   :  { %13 = vsyncpa [#allocation4], 0 }
   0x3   :  { %15 = vsyncpa [#allocation4 + $0x1], 0  ;;  %s2011_s21 = smov 0   ;;  %s2013_s22 = smov 0  }
   0x4   :  { %s2015_s23 = smov 0   ;;  %s2017_s24 = smov 0  }
   0x5 LB: > { %s2032_s25 = sadd.s32 4294967295, %s1968_s24   ;;  %s1332_s26 = sadd.s32 4294967294, %s1968_s24   ;;  %s1968_s24 = sphi %s2017_s24, %s2205_s24   ;;  %s1964_s23 = sphi %s2015_s23, %s2204_s23   ;;  %s1960_s22 = sphi %s2013_s22, %s2203_s22   ;;  %s1956_s21 = sphi %s2011_s21, %s2202_s21  }
   0x6   : > { %s2036_s27 = sadd.s32 1, %s1968_s24   ;;  %s159_s28 = sadd.s32 1, %s1964_s23 }
   0x7   : > { %s156_s29 = ssub.s32 %s1968_s24, %s2036_s27  ;;  %p169_p0 = scmp.ne.s32.totalorder %s1964_s23, %s1960_s22 }
   0x8   : > { %p157_p1 = scmp.eq.s32.totalorder %s156_s29, 0  ;;  %p170_p2 = scmp.eq.s32.totalorder %s2032_s25, 1 }
   0x9   : > { %p175_p3 = scmp.ne.s32.totalorder %s1960_s22, %s1956_s21  ;;  %p176_p4 = scmp.eq.s32.totalorder %s1332_s26, 1 }
   0xa   : > { %s2047_s30 = scalar_select %p157_p1, %s1964_s23, %s159_s28  }
   0xb   : > { %p2049_p5 = por %p170_p2, %p169_p0  ;;  %p2053_p6 = por %p176_p4, %p175_p3 }
   0xc   : > { %p1333_p7 = scmp.ge.s32.totalorder %s1968_s24, 1  ;;  %p183_p8 = scmp.lt.s32.totalorder %s1968_s24, 3 }
   0xd   : > { %p1778_p9 = scmp.eq.s32.totalorder %s2032_s25, 0  ;;  %s197_s12 = sshll.u32 %s2194_s2, 4  ;;  %s198_s12 = int_to_ptr.hbm [resolvable:$true] %s197_s12 }
   0xe   : > { %p2060_p10 = pnand %p1333_p7, %p183_p8  ;;  %s1970_s13 = smov [#allocation2]  }
   0xf   : > { %s199_s14 = sshll.u32 %s1970_s13, 4  ;;  %s214_s17 = sshll.u32 %s2196_s4, 4  ;;  %s200_s14 = int_to_ptr.vmem [resolvable:$true] %s199_s14  ;;  %s215_s17 = int_to_ptr.hbm [resolvable:$true] %s214_s17 }
  0x10   : > { %p1767_p11 = pneg %p2060_p10  ;;  %s1971_s18 = smov 192  }
  0x11   : > { %s1972_s19 = smov 12   ;;  %s1973_s20 = smov [#allocation5]  }
  0x12   : > { %p1768_p12 = pnand %p1778_p9, %p1767_p11  ;;  %s216_s26 = sshll.u32 %s1973_s20, 4  ;;  %s217_s26 = int_to_ptr.vmem [resolvable:$true] %s216_s26 }
  0x13   : > { %s1974_s28 = smov 64   ;;  %s1975_s29 = smov 4  }
  0x14   : > { %1770 = dma.hbm_to_vmem [thread:$0]  (!%p1768_p12), %s198_s12, 9216, %s200_s14, [#allocation3], %s1971_s18, %s1971_s18, %s1972_s19  }
  0x15   : > { %1773 = dma.hbm_to_vmem [thread:$0]  (!%p1768_p12), %s215_s17, 1024, %s217_s26, [#allocation6], %s1974_s28, %s1974_s28, %s1975_s29  }
  0x16   : > { %243 = sbr.rel (%p2060_p10) target bundleno = 871 (0x367), region = 44 }
  0x1b   : > { %1943 = dma.done.wait (%p1778_p9), [#allocation3], 9216  }
  0x1c   : > { %1945 = vsyncadd (%p1778_p9), [#allocation3], 4294958080 }
  0x1d   : > { %1947 = dma.done.wait (%p1778_p9), [#allocation6], 1024  }
  0x1e   : > { %1949 = vsyncadd (%p1778_p9), [#allocation6], 4294966272  ;;  %p278_p13 = scmp.lt.s32.totalorder %s2032_s25, 1  ;;  %v285_v0 = vld [vmem:[%s2193_s1] sm:$0xff]  ;;  %v286_v1 = vld [vmem:[%s2193_s1 + $0x8] sm:$0xf]  ;;  %v378_v25 = vlaneseq  ;;  %s1251_s16 = scalar_lea.hbm %s2198_s6, %s2032_s25 }
  0x1f   : > { %289 = vst [vmem:[#allocation1] ss:$2 sm:$0xff] %v285_v0  ;;  %vm302_vm0 = vcmask 1043456   ;;  %vm295_vm1 = vcmask 31744   ;;  %v1437_v7 = vld [vmem:[#allocation2 + $0xa8] sm:$0xf] }
  0x20   : > { %s279_s10 = scalar_select %p278_p13, %s2032_s25, 1  ;;  %291 = vst [vmem:[#allocation1 + $0x10] ss:$2 sm:$0xff] %v286_v1  ;;  %v1699_v8 = vld [vmem:[#allocation2 + $0xb0] sm:$0xf0]  ;;  %v2097_v36 = vshrl.u32 %v378_v25, 7 }
  0x21   : > { %v1698_v9 = vld [vmem:[#allocation2 + $0xac] sm:$0xf]  ;;  %v1438_v10 = vor.u32 %v1699_v8, %v1437_v7  ;;  %v1439_v11 = vld [vmem:[#allocation2 + $0xb4] sm:$0xf0]  ;;  %v1445_v12 = vld [vmem:[#allocation2 + $0xb0] sm:$0xf] }
  0x22   : > { %s1676_s14 = sshll.u32 %s279_s10, 4  ;;  %v1700_v13 = vld [vmem:[#allocation2 + $0xb8] sm:$0xf0]  ;;  %v1442_v14 = vor.u32 %v1698_v9, %v1439_v11  ;;  %v1425_v16 = vld [vmem:[#allocation2 + $0x90] sm:$0xf]  ;;  %vm385_vm2 = vcmp.lt.s32.totalorder %v2097_v36, 1 }
  0x23   : > { %s282_s17 = scalar_lea.vmem %s2192_s0, %s1676_s14  ;;  %v1446_v15 = vor.u32 %v1700_v13, %v1445_v12  ;;  %588 = vmatpush.bf16.msra.mxu3 %v1438_v10  ;;  %v1696_v17 = vld [vmem:[#allocation2 + $0x98] sm:$0xf0]  ;;  %v1695_v18 = vld [vmem:[#allocation2 + $0x94] sm:$0xf]  ;;  %v1427_v20 = vld [vmem:[#allocation2 + $0x9c] sm:$0xf0] }
  0x24   : > { %v283_v2 = vld [vmem:[%s282_s17] sm:$0xff]  ;;  %v284_v6 = vld [vmem:[%s282_s17 + $0x8] sm:$0xff]  ;;  %602 = vmatpush.bf16.msra.mxu0 %v1442_v14  ;;  %v1426_v19 = vor.u32 %v1696_v17, %v1425_v16  ;;  %v1430_v23 = vor.u32 %v1695_v18, %v1427_v20  ;;  %v1415_v31 = vld [vmem:[#allocation2 + $0x84] sm:$0xf0]  ;;  %vm381_vm3 = vcmp.ge.s32.totalorder %v2097_v36, 1  ;;  %vm394_vm4 = vcmp.lt.s32.totalorder %v2097_v36, 7 }
  0x25   : > { %v1433_v21 = vld [vmem:[#allocation2 + $0x98] sm:$0xf]  ;;  %v1697_v22 = vld [vmem:[#allocation2 + $0xa0] sm:$0xf0]  ;;  %v1692_v28 = vld [vmem:[#allocation2 + $0x7c] sm:$0xf] }
  0x26   : > { %v292_v3 = vld.sshfl [vmem:[#allocation1] sm:$0xff pattern:$0x75316420]  ;;  %v293_v4 = vld.sshfl [vmem:[#allocation1 + $0x8] sm:$0xff pattern:$0x75316420]  ;;  %v1434_v24 = vor.u32 %v1697_v22, %v1433_v21  ;;  %v1418_v34 = vor.u32 %v1692_v28, %v1415_v31 }
  0x27   : > { %1342 = vmatpush.msk.msra.mxu1 %vm302_vm0, %v292_v3  ;;  %v294_v5 = vld.sshfl [vmem:[#allocation1 + $0x10] sm:$0xff pattern:$0x75316420]  ;;  %589 = vmatpush.bf16.msra.mxu3 %v1426_v19  ;;  %v1413_v26 = vld [vmem:[#allocation2 + $0x78] sm:$0xf]  ;;  %vm643_vm6 = vcmp.lt.s32.totalorder %v2097_v36, 6 }
  0x28   : > { %1348 = vmatpush.msk.msra.mxu2 %vm302_vm0, %v294_v5  ;;  %1343 = vmatmul.msk.f32.vlgmr.msra.gmra.mxu1 %vm295_vm1, %v283_v2  ;;  %v1693_v27 = vld [vmem:[#allocation2 + $0x80] sm:$0xf0]  ;;  %v1421_v32 = vld [vmem:[#allocation2 + $0x80] sm:$0xf]  ;;  %v1694_v33 = vld [vmem:[#allocation2 + $0x88] sm:$0xf0] }
  0x29   : > { %1345 = vmatpush.msk.msrb.mxu1 %vm302_vm0, %v293_v4  ;;  %1349 = vmatmul.msk.f32.vlgmr.msra.gmra.mxu2 %vm295_vm1, %v283_v2  ;;  %v1414_v30 = vor.u32 %v1693_v27, %v1413_v26  ;;  %v1422_v35 = vor.u32 %v1694_v33, %v1421_v32  ;;  %v1401_v37 = vld [vmem:[#allocation2 + $0x60] sm:$0xf]  ;;  %v1690_v38 = vld [vmem:[#allocation2 + $0x68] sm:$0xf0]  ;;  %v1689_v39 = vld [vmem:[#allocation2 + $0x64] sm:$0xf] }
  0x2a   : > { %603 = vmatpush.bf16.msra.mxu0 %v1430_v23  ;;  %v1402_v40 = vor.u32 %v1690_v38, %v1401_v37  ;;  %v1403_v41 = vld [vmem:[#allocation2 + $0x6c] sm:$0xf0]  ;;  %v1409_v42 = vld [vmem:[#allocation2 + $0x68] sm:$0xf]  ;;  %v1691_v43 = vld [vmem:[#allocation2 + $0x70] sm:$0xf0] }
  0x2b   : > { %616 = vmatpush.bf16.msra.mxu1 %v1446_v15  ;;  %590 = vmatpush.bf16.msra.mxu3 %v1414_v30  ;;  %v1406_v44 = vor.u32 %v1689_v39, %v1403_v41  ;;  %v1410_v45 = vor.u32 %v1691_v43, %v1409_v42  ;;  %v1389_v46 = vld [vmem:[#allocation2 + $0x48] sm:$0xf]  ;;  %v1687_v47 = vld [vmem:[#allocation2 + $0x50] sm:$0xf0]  ;;  %v1686_v48 = vld [vmem:[#allocation2 + $0x4c] sm:$0xf] }
  0x2c   : > { %v1390_v49 = vor.u32 %v1687_v47, %v1389_v46  ;;  %v1391_v50 = vld [vmem:[#allocation2 + $0x54] sm:$0xf0]  ;;  %v1397_v51 = vld [vmem:[#allocation2 + $0x50] sm:$0xf]  ;;  %v1688_v52 = vld [vmem:[#allocation2 + $0x58] sm:$0xf0] }
  0x2d   : > { %v1394_v54 = vor.u32 %v1686_v48, %v1391_v50  ;;  %v1398_v55 = vor.u32 %v1688_v52, %v1397_v51  ;;  %v1377_v56 = vld [vmem:[#allocation2 + $0x30] sm:$0xf]  ;;  %v1684_v57 = vld [vmem:[#allocation2 + $0x38] sm:$0xf0]  ;;  %v1683_v59 = vld [vmem:[#allocation2 + $0x34] sm:$0xf] }
  0x2e   : > { %604 = vmatpush.bf16.msra.mxu0 %v1418_v34  ;;  %v1379_v60 = vld [vmem:[#allocation2 + $0x3c] sm:$0xf0]  ;;  %v1385_v61 = vld [vmem:[#allocation2 + $0x38] sm:$0xf]  ;;  %v1685_v63 = vld [vmem:[#allocation2 + $0x40] sm:$0xf0]  ;;  %v1378_v1 = vor.u32 %v1684_v57, %v1377_v56 }
  0x2f   : > { %617 = vmatpush.bf16.msra.mxu1 %v1434_v24  ;;  %591 = vmatpush.bf16.msra.mxu3 %v1402_v40  ;;  %v1386_v3 = vor.u32 %v1685_v63, %v1385_v61  ;;  %v1365_v4 = vld [vmem:[#allocation2 + $0x18] sm:$0xf]  ;;  %v1681_v5 = vld [vmem:[#allocation2 + $0x20] sm:$0xf0]  ;;  %v1367_v7 = vld [vmem:[#allocation2 + $0x24] sm:$0xf0] }
  0x30   : > { %1344 = vmatmul.msk.f32.gmra.mxu1 %vm295_vm1, %v284_v6  ;;  %v1373_v8 = vld [vmem:[#allocation2 + $0x20] sm:$0xf]  ;;  %v1682_v9 = vld [vmem:[#allocation2 + $0x28] sm:$0xf0]  ;;  %v1366_v12 = vor.u32 %v1681_v5, %v1365_v4  ;;  %v1677_v18 = vld [vmem:[#allocation2 + $0x4] sm:$0xf] }
  0x31   : > { %1350 = vmatmul.msk.f32.gmra.mxu2 %vm295_vm1, %v284_v6  ;;  %v1353_v13 = vld [vmem:[#allocation2] sm:$0xf]  ;;  %v1374_v16 = vor.u32 %v1682_v9, %v1373_v8  ;;  %v1678_v17 = vld [vmem:[#allocation2 + $0x8] sm:$0xf0]  ;;  %v1355_v19 = vld [vmem:[#allocation2 + $0xc] sm:$0xf0] }
  0x32   : > { %605 = vmatpush.bf16.msra.mxu0 %v1406_v44  ;;  %v1361_v23 = vld [vmem:[#allocation2 + $0x8] sm:$0xf]  ;;  %v1679_v24 = vld [vmem:[#allocation2 + $0x10] sm:$0xf0]  ;;  %v1821_v26 = vld [vmem:[%s2195_s3] ss:$0 sm:$0xff]  ;;  %v1354_v28 = vor.u32 %v1678_v17, %v1353_v13  ;;  %v1358_v31 = vor.u32 %v1677_v18, %v1355_v19 }
  0x33   : > { %618 = vmatpush.bf16.msra.mxu1 %v1422_v35  ;;  %592 = vmatpush.bf16.msra.mxu3 %v1390_v49  ;;  %v2116_v30 = vadd.s32 8, %v2097_v36  ;;  %v1362_v32 = vor.u32 %v1679_v24, %v1361_v23  ;;  %v1534_v61 = vld [vmem:[#allocation2 + $0x168] sm:$0xf]  ;;  %v1722_v63 = vld [vmem:[#allocation2 + $0x16c] sm:$0xf]  ;;  %vm634_vm7 = vcmp.lt.s32.totalorder %v2097_v36, 2 }
  0x34   : > { %v1719_v9 = vld [vmem:[#allocation2 + $0x154] sm:$0xf]  ;;  %v1721_v13 = vld [vmem:[#allocation2 + $0x160] sm:$0xf0]  ;;  %v1716_v18 = vld [vmem:[#allocation2 + $0x13c] sm:$0xf] }
  0x35   : > { %vm391_vm5 = vcmp.lt.s32.totalorder %v2116_v30, 15  ;;  %v1512_v19 = vld [vmem:[#allocation2 + $0x144] sm:$0xf0]  ;;  %v1498_v23 = vld [vmem:[#allocation2 + $0x120] sm:$0xf]  ;;  %vm630_vm8 = vcmp.ge.s32.totalorder %v2097_v36, 2 }
  0x36   : > { %606 = vmatpush.bf16.msra.mxu0 %v1394_v54  ;;  %v1714_v24 = vld [vmem:[#allocation2 + $0x128] sm:$0xf0]  ;;  %vm640_vm9 = vcmp.lt.s32.totalorder %v2116_v30, 14  ;;  %vm885_vm10 = vcmp.lt.s32.totalorder %v2097_v36, 4  ;;  %vm881_vm11 = vcmp.ge.s32.totalorder %v2097_v36, 4  ;;  %vm891_vm12 = vcmp.lt.s32.totalorder %v2116_v30, 12 }
  0x37   : > { %619 = vmatpush.bf16.msra.mxu1 %v1410_v45  ;;  %593 = vmatpush.bf16.msra.mxu3 %v1378_v1  ;;  %v1536_v1 = vld [vmem:[#allocation2 + $0x174] sm:$0xf0]  ;;  %s276_s13 = sand.u32 1, %s1960_s22   ;;  %s1255_s19 = sshll.u32 %s1251_s16, 4  ;;  %vm1240_vm13 = vcmask 253952   ;;  %s1256_s19 = int_to_ptr.hbm [resolvable:$true] %s1255_s19 }
  0x38   : > { %1346 = vmatmul.msk.f32.vlgmr.msrb.gmra.mxu1 %vm295_vm1, %v283_v2  ;;  %v1382_v2 = vor.u32 %v1683_v59, %v1379_v60  ;;  %v1539_v4 = vor.u32 %v1722_v63, %v1536_v1  ;;  %v1450_v1 = vld [vmem:[#allocation2 + $0xc0] sm:$0xf]  ;;  %s277_s17 = scalar_lea.vmem [#allocation7], %s276_s13  ;;  %s1243_s20 = scalar_lea.sflag [#allocation4], %s276_s13 }
  0x39   : > { %s1253_s18 = sshll.u32 %s277_s17, 4  ;;  %s1912_s26 = sshra.s32 %s1256_s19, 4  ;;  %s1254_s18 = int_to_ptr.vmem [resolvable:$true] %s1253_s18  ;;  %s1913_s26 = int_to_ptr.hbm [resolvable:$true] %s1912_s26 }
  0x3a   : > { %607 = vmatpush.bf16.msra.mxu0 %v1382_v2  ;;  %v1542_v2 = vld [vmem:[#allocation2 + $0x170] sm:$0xf]  ;;  %s1914_s28 = scalar_lea.hbm %s1913_s26, 1  ;;  %s1918_s10 = scalar_lea.hbm %s2198_s6, 2 }
  0x3b   : > { %620 = vmatpush.bf16.msra.mxu1 %v1398_v55  ;;  %594 = vmatpush.bf16.msra.mxu3 %v1366_v12  ;;  %p1915_p0 = scmp.ne.s32.totalorder %s1913_s26, %s1914_s28  ;;  %p1919_p3 = scmp.lt.s32.totalorder %s1913_s26, %s2198_s6 }
  0x3c   : > { %p1920_p4 = scmp.lt.s32.totalorder %s1918_s10, %s1914_s28 }
  0x3d   : > { %p1916_p1 = pnand %p1915_p0, %p2049_p5 }
  0x3e   : > { %p1921_p7 = por %p1920_p4, %p1919_p3 }
  0x3f   : > { %621 = vmatpush.bf16.msra.mxu1 %v1386_v3  ;;  %595 = vmatpush.bf16.msra.mxu3 %v1354_v28  ;;  %v1724_v3 = vld [vmem:[#allocation2 + $0x178] sm:$0xf0]  ;;  %v1506_v28 = vld [vmem:[#allocation2 + $0x128] sm:$0xf]  ;;  %p1917_p2 = pneg %p1916_p1 }
  0x40   : > { %1347 = vmatmul.msk.f32.gmra.mxu1 %vm295_vm1, %v284_v6  ;;  %v1680_v6 = vld [vmem:[#allocation2 + $0x1c] sm:$0xf]  ;;  %v1543_v5 = vor.u32 %v1724_v3, %v1542_v2  ;;  %v1702_v2 = vld [vmem:[#allocation2 + $0xc8] sm:$0xf0] }
  0x41   : > { %v1370_v15 = vor.u32 %v1680_v6, %v1367_v7  ;;  %v1522_v6 = vld [vmem:[#allocation2 + $0x150] sm:$0xf]  ;;  %v1720_v7 = vld [vmem:[#allocation2 + $0x158] sm:$0xf0]  ;;  %p1922_p8 = pnand %p1921_p7, %p1917_p2 }
  0x42   : > { %v1523_v8 = vor.u32 %v1720_v7, %v1522_v6  ;;  %v1458_v6 = vld [vmem:[#allocation2 + $0xc8] sm:$0xf]  ;;  %v1703_v7 = vld [vmem:[#allocation2 + $0xd0] sm:$0xf0] }
  0x43   : > { %608 = vmatpush.bf16.msra.mxu0 %v1370_v15  ;;  %622 = vmatpush.bf16.msra.mxu1 %v1374_v16  ;;  %v1717_v15 = vld [vmem:[#allocation2 + $0x140] sm:$0xf0] }
  0x44   : > { %853 = vmatpush.bf16.msrb.mxu3 %v1539_v4  ;;  %v1701_v4 = vld [vmem:[#allocation2 + $0xc4] sm:$0xf] }
  0x47   : > { %609 = vmatpush.bf16.msra.mxu0 %v1358_v31  ;;  %623 = vmatpush.bf16.msra.mxu1 %v1362_v32  ;;  %v1499_v31 = vor.u32 %v1714_v24, %v1498_v23 }
  0x4b   : > { %867 = vmatpush.bf16.msrb.mxu0 %v1543_v5  ;;  %v1452_v5 = vld [vmem:[#allocation2 + $0xcc] sm:$0xf0] }
  0xa5   : > { %v2095_v29 = vpop.f32.mrf.mxu1 }
  0xa6   : > { %v383_v0 = vrot.slane %v2095_v29, 7 }
  0xac   : > { %v2099_v53 = vpop.f32.mrf.mxu2 }
  0xad   : > { %v329_v58 = vpop.f32.mrf.mxu1  ;;  %v392_v11 = vrot.slane %v2099_v53, 1 }
  0xae   : > { %v384_v62 = vrot.slane %v329_v58, 7 }
  0xb0   : > { %v387_v10 = vsel %vm385_vm2, %v384_v62, %v383_v0  ;;  %v386_v38 = vsel %vm385_vm2, %v383_v0, %v384_v62  ;;  %v1723_v62 = vld [vmem:[#allocation2 + $0x170] sm:$0xf0] }
  0xb1   : > { %v388_v22 = vsel %vm381_vm3, %v387_v10, 0.0  ;;  %v1535_v0 = vor.u32 %v1723_v62, %v1534_v61  ;;  %v1524_v10 = vld [vmem:[#allocation2 + $0x15c] sm:$0xf0]  ;;  %v1706_v61 = vld [vmem:[#allocation2 + $0xe8] sm:$0xf0] }
  0xb2   : > { %v1527_v12 = vor.u32 %v1719_v9, %v1524_v10  ;;  %v1451_v9 = vor.u32 %v1702_v2, %v1450_v1  ;;  %v1455_v10 = vor.u32 %v1701_v4, %v1452_v5  ;;  %v1627_v1 = vld [vmem:[#allocation2 + $0x218] sm:$0xf] }
  0xb3   : > { %839 = vmatpush.bf16.msrb.mxu2 %v1535_v0  ;;  %v1607_v5 = vld [vmem:[#allocation2 + $0x1f8] sm:$0xf] }
  0xb4   : > { %v375_v14 = vpop.f32.mrf.mxu2  ;;  %854 = vmatpush.bf16.msrb.mxu3 %v1527_v12 }
  0xb5   : > { %v393_v20 = vrot.slane %v375_v14, 1  ;;  %v349_v21 = vpop.f32.mrf.mxu1  ;;  %v1510_v14 = vld [vmem:[#allocation2 + $0x138] sm:$0xf] }
  0xb6   : > { %v399_v25 = vadd.f32 %v388_v22, %v349_v21  ;;  %v1511_v17 = vor.u32 %v1717_v15, %v1510_v14  ;;  %v1515_v21 = vor.u32 %v1716_v18, %v1512_v19  ;;  %v1718_v22 = vld [vmem:[#allocation2 + $0x148] sm:$0xf0] }
  0xb7   : > { %v395_v27 = vsel %vm394_vm4, %v392_v11, %v393_v20  ;;  %v396_v35 = vsel %vm394_vm4, %v393_v20, %v392_v11  ;;  %v1530_v11 = vld [vmem:[#allocation2 + $0x158] sm:$0xf]  ;;  %840 = vmatpush.bf16.msrb.mxu2 %v1523_v8  ;;  %v1518_v20 = vld [vmem:[#allocation2 + $0x140] sm:$0xf] }
  0xb8   : > { %v401_v29 = vadd.f32 %v399_v25, %v395_v27  ;;  %v398_v41 = vsel %vm391_vm5, %v396_v35, 0.0  ;;  %v1531_v16 = vor.u32 %v1721_v13, %v1530_v11  ;;  %v1519_v25 = vor.u32 %v1718_v22, %v1518_v20  ;;  %v1500_v27 = vld [vmem:[#allocation2 + $0x12c] sm:$0xf0]  ;;  %855 = vmatpush.bf16.msrb.mxu3 %v1515_v21  ;;  %v1822_v22 = vld [vmem:[%s2195_s3 + $0x1] ss:$0 sm:$0xff] }
  0xb9   : > { %v1459_v13 = vor.u32 %v1703_v7, %v1458_v6  ;;  %v1741_v6 = vld [vmem:[#allocation2 + $0x200] sm:$0xf0]  ;;  %v1740_v7 = vld [vmem:[#allocation2 + $0x1fc] sm:$0xf] }
  0xba   : > { %v407_v33 = vadd.f32 %v1821_v26, %v401_v29  ;;  %868 = vmatpush.bf16.msrb.mxu0 %v1531_v16  ;;  %v1715_v29 = vld [vmem:[#allocation2 + $0x130] sm:$0xf0] }
  0xbb   : > { %841 = vmatpush.bf16.msrb.mxu2 %v1511_v17  ;;  %v1507_v35 = vor.u32 %v1715_v29, %v1506_v28 }
  0xbc   : > { %v409_v34 = vmul.f32 %v407_v33, %v407_v33 }
  0xbd   : > { %v352_v37 = vpop.f32.mrf.mxu1 }
  0xbe   : > { %v411_v39 = vmul.f32 %v409_v34, %v407_v33  ;;  %v400_v40 = vadd.f32 %v386_v38, %v352_v37  ;;  %v1711_v34 = vld [vmem:[#allocation2 + $0x110] sm:$0xf0]  ;;  %869 = vmatpush.bf16.msrb.mxu0 %v1519_v25  ;;  %v1710_v37 = vld [vmem:[#allocation2 + $0x10c] sm:$0xf]  ;;  %v1488_v38 = vld [vmem:[#allocation2 + $0x114] sm:$0xf0] }
  0xbf   : > { %842 = vmatpush.bf16.msrb.mxu2 %v1499_v31 }
  0xc0   : > { %v413_v42 = vmul.f32 0.044715, %v411_v39  ;;  %v402_v43 = vadd.f32 %v400_v40, %v398_v41  ;;  %v1494_v39 = vld [vmem:[#allocation2 + $0x110] sm:$0xf]  ;;  %v1712_v40 = vld [vmem:[#allocation2 + $0x118] sm:$0xf0] }
  0xc2   : > { %v408_v44 = vadd.f32 %v1821_v26, %v402_v43  ;;  %v415_v45 = vadd.f32 %v413_v42, %v407_v33  ;;  %v1713_v26 = vld [vmem:[#allocation2 + $0x124] sm:$0xf]  ;;  %v1491_v43 = vor.u32 %v1710_v37, %v1488_v38  ;;  %870 = vmatpush.bf16.msrb.mxu0 %v1507_v35 }
  0xc3   : > { %v1503_v32 = vor.u32 %v1713_v26, %v1500_v27 }
  0xc4   : > { %v410_v46 = vmul.f32 %v408_v44, %v408_v44  ;;  %v417_v47 = vmul.f32 0.7978846, %v415_v45  ;;  %v1708_v45 = vld [vmem:[#allocation2 + $0xf8] sm:$0xf0] }
  0xc5   : > { %856 = vmatpush.bf16.msrb.mxu3 %v1503_v32 }
  0xc6   : > { %v412_v48 = vmul.f32 %v410_v46, %v408_v44  ;;  %1826 = vtanh.f32 %v417_v47  ;;  %v1495_v46 = vor.u32 %v1712_v40, %v1494_v39  ;;  %v1707_v47 = vld [vmem:[#allocation2 + $0xf4] sm:$0xf] }
  0xc8   : > { %v414_v49 = vmul.f32 0.044715, %v412_v48  ;;  %v1476_v48 = vld [vmem:[#allocation2 + $0xfc] sm:$0xf0]  ;;  %871 = vmatpush.bf16.msrb.mxu0 %v1495_v46 }
  0xc9   : > { %857 = vmatpush.bf16.msrb.mxu3 %v1491_v43 }
  0xca   : > { %v416_v50 = vadd.f32 %v414_v49, %v408_v44  ;;  %v1482_v49 = vld [vmem:[#allocation2 + $0xf8] sm:$0xf] }
  0xcc   : > { %v418_v51 = vmul.f32 0.7978846, %v416_v50  ;;  %v1827_v52 = vpop.eup %1826  ;;  %v1709_v50 = vld [vmem:[#allocation2 + $0x100] sm:$0xf0] }
  0xcd   : > { %v421_v53 = vadd.f32 1.0, %v1827_v52  ;;  %v1479_v52 = vor.u32 %v1707_v47, %v1476_v48 }
  0xce   : > { %1828 = vtanh.f32 %v418_v51 }
  0xcf   : > { %v423_v56 = vmul.f32 0.5, %v421_v53  ;;  %v1462_v53 = vld [vmem:[#allocation2 + $0xd8] sm:$0xf]  ;;  %858 = vmatpush.bf16.msrb.mxu3 %v1479_v52  ;;  %v1747_v52 = vld [vmem:[#allocation2 + $0x230] sm:$0xf0] }
  0xd1   : > { %v425_v58 = vmul.f32 %v423_v56, %v407_v33  ;;  %v1486_v33 = vld [vmem:[#allocation2 + $0x108] sm:$0xf]  ;;  %v1483_v56 = vor.u32 %v1709_v50, %v1482_v49 }
  0xd2   : > { %v1487_v41 = vor.u32 %v1711_v34, %v1486_v33 }
  0xd3   : > { %872 = vmatpush.bf16.msrb.mxu0 %v1483_v56  ;;  %v1639_v56 = vld [vmem:[#allocation2 + $0x230] sm:$0xf] }
  0xd4   : > { %v1829_v54 = vpop.eup %1828  ;;  %843 = vmatpush.bf16.msrb.mxu2 %v1487_v41 }
  0xd5   : > { %v422_v55 = vadd.f32 1.0, %v1829_v54  ;;  %v1705_v54 = vld [vmem:[#allocation2 + $0xe0] sm:$0xf0] }
  0xd6   : > { %v1463_v62 = vor.u32 %v1705_v54, %v1462_v53  ;;  %v1746_v53 = vld [vmem:[#allocation2 + $0x22c] sm:$0xf] }
  0xd7   : > { %v424_v57 = vmul.f32 0.5, %v422_v55 }
  0xd9   : > { %v426_v59 = vmul.f32 %v424_v57, %v408_v44  ;;  %v1474_v44 = vld [vmem:[#allocation2 + $0xf0] sm:$0xf]  ;;  %v1704_v57 = vld [vmem:[#allocation2 + $0xdc] sm:$0xf] }
  0xda   : > { %v1475_v51 = vor.u32 %v1708_v45, %v1474_v44 }
  0xdb   : > { %v427_v60 = vpack.c.bf16 %v426_v59, %v425_v58  ;;  %v1464_v58 = vld [vmem:[#allocation2 + $0xe4] sm:$0xf0] }
  0xdc   : > { %844 = vmatpush.bf16.msrb.mxu2 %v1475_v51  ;;  %v1467_v0 = vor.u32 %v1704_v57, %v1464_v58  ;;  %v1631_v51 = vld [vmem:[#allocation2 + $0x228] sm:$0xf]  ;;  %v1748_v57 = vld [vmem:[#allocation2 + $0x238] sm:$0xf0] }
  0xdd   : > { %596 = vmatmul.bf16.vlgmr.msra.gmra.mxu3 %v427_v60  ;;  %610 = vmatmul.bf16.vlgmr.msra.gmra.mxu0 %v427_v60  ;;  %v1632_v54 = vor.u32 %v1747_v52, %v1631_v51  ;;  %v1730_v51 = vld [vmem:[#allocation2 + $0x1a8] sm:$0xf0] }
  0xde   : > { %624 = vmatmul.bf16.vlgmr.msra.gmra.mxu1 %v427_v60  ;;  %v1470_v60 = vld [vmem:[#allocation2 + $0xe0] sm:$0xf]  ;;  %859 = vmatpush.bf16.msrb.mxu3 %v1467_v0 }
  0xdf   : > { %v1471_v3 = vor.u32 %v1706_v61, %v1470_v60  ;;  %1089 = vmatpush.bf16.msrb.mxu1 %v1632_v54  ;;  %v1619_v60 = vld [vmem:[#allocation2 + $0x210] sm:$0xf]  ;;  %v1744_v61 = vld [vmem:[#allocation2 + $0x218] sm:$0xf0]  ;;  %v1621_v0 = vld [vmem:[#allocation2 + $0x21c] sm:$0xf0] }
  0xe0   : > { %845 = vmatpush.bf16.msrb.mxu2 %v1463_v62  ;;  %v1620_v62 = vor.u32 %v1744_v61, %v1619_v60  ;;  %v1555_v60 = vld [vmem:[#allocation2 + $0x188] sm:$0xf]  ;;  %v1727_v61 = vld [vmem:[#allocation2 + $0x190] sm:$0xf0] }
  0xe1   : > { %873 = vmatpush.bf16.msrb.mxu0 %v1471_v3  ;;  %v1745_v3 = vld [vmem:[#allocation2 + $0x220] sm:$0xf0] }
  0xe2   : > { %860 = vmatpush.bf16.msrb.mxu3 %v1455_v10  ;;  %v1628_v4 = vor.u32 %v1745_v3, %v1627_v1  ;;  %v1615_v10 = vld [vmem:[#allocation2 + $0x200] sm:$0xf]  ;;  %v1556_v3 = vor.u32 %v1727_v61, %v1555_v60  ;;  %v1825_v60 = vld [vmem:[%s2197_s5] ss:$0 sm:$0xff] }
  0xe3   : > { %1090 = vmatpush.bf16.msrb.mxu1 %v1620_v62 }
  0xe4   : > { %846 = vmatpush.bf16.msrb.mxu2 %v1451_v9  ;;  %v1609_v9 = vld [vmem:[#allocation2 + $0x204] sm:$0xf0] }
  0xe5   : > { %874 = vmatpush.bf16.msrb.mxu0 %v1459_v13 }
 0x15a   : > { %v611_v59 = vpop.f32.mrf.mxu0 }
 0x15b   : > { %v2123_v42 = vpop.f32.mrf.mxu1 }
 0x15c   : > { %v641_v11 = vrot.slane %v2123_v42, 2 }
 0x160   : > { %v597_v55 = vpop.f32.mrf.mxu3 }
 0x161   : > { %v632_v14 = vrot.slane %v597_v55, 6  ;;  %v1633_v55 = vld [vmem:[#allocation2 + $0x234] sm:$0xf0] }
 0x162   : > { %v613_v17 = vpop.f32.mrf.mxu0  ;;  %v1636_v58 = vor.u32 %v1746_v53, %v1633_v55  ;;  %v1547_v55 = vld [vmem:[#allocation2 + $0x180] sm:$0xf] }
 0x163   : > { %v627_v63 = vpop.f32.mrf.mxu1 }
 0x164   : > { %v642_v8 = vrot.slane %v627_v63, 2  ;;  %1103 = vmatpush.bf16.msra.mxu2 %v1636_v58  ;;  %v1743_v63 = vld [vmem:[#allocation2 + $0x214] sm:$0xf]  ;;  %v1725_v58 = vld [vmem:[#allocation2 + $0x184] sm:$0xf] }
 0x165   : > { %v1624_v2 = vor.u32 %v1743_v63, %v1621_v0 }
 0x166   : > { %v645_v16 = vsel %vm643_vm6, %v642_v8, %v641_v11  ;;  %v644_v25 = vsel %vm643_vm6, %v641_v11, %v642_v8  ;;  %v1608_v8 = vor.u32 %v1741_v6, %v1607_v5  ;;  %v1742_v11 = vld [vmem:[#allocation2 + $0x208] sm:$0xf0] }
 0x167   : > { %v647_v23 = vsel %vm640_vm9, %v645_v16, 0.0  ;;  %v1616_v13 = vor.u32 %v1742_v11, %v1615_v10  ;;  %v1737_v16 = vld [vmem:[#allocation2 + $0x1e4] sm:$0xf] }
 0x168   : > { %v599_v12 = vpop.f32.mrf.mxu3  ;;  %1104 = vmatpush.bf16.msra.mxu2 %v1624_v2  ;;  %1091 = vmatpush.bf16.msrb.mxu1 %v1608_v8 }
 0x169   : > { %v633_v15 = vrot.slane %v599_v12, 6  ;;  %v1612_v12 = vor.u32 %v1740_v7, %v1609_v9 }
 0x16b   : > { %v635_v18 = vsel %vm634_vm7, %v632_v14, %v633_v15  ;;  %v636_v19 = vsel %vm634_vm7, %v633_v15, %v632_v14  ;;  %v1595_v14 = vld [vmem:[#allocation2 + $0x1e0] sm:$0xf]  ;;  %v1738_v15 = vld [vmem:[#allocation2 + $0x1e8] sm:$0xf0] }
 0x16c   : > { %v637_v20 = vsel %vm630_vm8, %v636_v19, 0.0  ;;  %v649_v21 = vadd.f32 %v635_v18, %v613_v17  ;;  %1105 = vmatpush.bf16.msra.mxu2 %v1612_v12  ;;  %v1596_v17 = vor.u32 %v1738_v15, %v1595_v14  ;;  %v1597_v18 = vld [vmem:[#allocation2 + $0x1ec] sm:$0xf0]  ;;  %v1603_v19 = vld [vmem:[#allocation2 + $0x1e8] sm:$0xf]  ;;  %v1756_v14 = vld [vmem:[#allocation5 + $0x38] sm:$0xff] }
 0x16d   : > { %v648_v24 = vadd.f32 %v637_v20, %v611_v59  ;;  %v1640_v59 = vor.u32 %v1748_v57, %v1639_v56  ;;  %v1739_v20 = vld [vmem:[#allocation2 + $0x1f0] sm:$0xf0]  ;;  %v1726_v56 = vld [vmem:[#allocation2 + $0x188] sm:$0xf0]  ;;  %v1823_v12 = vld [vmem:[%s2195_s3 + $0x2] ss:$0 sm:$0xff]  ;;  %1219 = vmatpush.bf16.msra.mxu0 %v1756_v14 }
 0x16e   : > { %v651_v26 = vadd.f32 %v649_v21, %v647_v23  ;;  %v1600_v21 = vor.u32 %v1737_v16, %v1597_v18  ;;  %1092 = vmatpush.bf16.msrb.mxu1 %v1596_v17  ;;  %v1548_v63 = vor.u32 %v1726_v56, %v1547_v55  ;;  %v1755_v18 = vld [vmem:[#allocation5 + $0x30] sm:$0xff] }
 0x16f   : > { %v650_v27 = vadd.f32 %v648_v24, %v644_v25  ;;  %1117 = vmatpush.bf16.msra.mxu3 %v1640_v59  ;;  %v1583_v24 = vld [vmem:[#allocation2 + $0x1c8] sm:$0xf]  ;;  %v1735_v25 = vld [vmem:[#allocation2 + $0x1d0] sm:$0xf0]  ;;  %v1549_v59 = vld [vmem:[#allocation2 + $0x18c] sm:$0xf0] }
 0x170   : > { %v658_v28 = vadd.f32 %v1822_v22, %v651_v26  ;;  %1106 = vmatpush.bf16.msra.mxu2 %v1600_v21  ;;  %v1734_v26 = vld [vmem:[#allocation2 + $0x1cc] sm:$0xf]  ;;  %v1552_v0 = vor.u32 %v1725_v58, %v1549_v59 }
 0x171   : > { %v657_v29 = vadd.f32 %v1822_v22, %v650_v27  ;;  %v1604_v22 = vor.u32 %v1739_v20, %v1603_v19  ;;  %v1584_v27 = vor.u32 %v1735_v25, %v1583_v24  ;;  %1220 = vmatpush.bf16.msra.mxu0 %v1755_v18 }
 0x172   : > { %v660_v31 = vmul.f32 %v658_v28, %v658_v28 }
 0x173   : > { %v659_v32 = vmul.f32 %v657_v29, %v657_v29  ;;  %1118 = vmatpush.bf16.msra.mxu3 %v1628_v4  ;;  %1093 = vmatpush.bf16.msrb.mxu1 %v1584_v27 }
 0x174   : > { %v662_v33 = vmul.f32 %v660_v31, %v658_v28 }
 0x175   : > { %v661_v34 = vmul.f32 %v659_v32, %v657_v29  ;;  %v1736_v32 = vld [vmem:[#allocation2 + $0x1d8] sm:$0xf0] }
 0x176   : > { %v664_v35 = vmul.f32 0.044715, %v662_v33  ;;  %v1571_v33 = vld [vmem:[#allocation2 + $0x1b0] sm:$0xf] }
 0x177   : > { %v663_v37 = vmul.f32 0.044715, %v661_v34  ;;  %1119 = vmatpush.bf16.msra.mxu3 %v1616_v13  ;;  %v1732_v34 = vld [vmem:[#allocation2 + $0x1b8] sm:$0xf0] }
 0x178   : > { %v666_v38 = vadd.f32 %v664_v35, %v658_v28 }
 0x179   : > { %v665_v39 = vadd.f32 %v663_v37, %v657_v29  ;;  %v1572_v37 = vor.u32 %v1732_v34, %v1571_v33 }
 0x17a   : > { %v668_v40 = vmul.f32 0.7978846, %v666_v38  ;;  %v1731_v38 = vld [vmem:[#allocation2 + $0x1b4] sm:$0xf] }
 0x17b   : > { %v667_v41 = vmul.f32 0.7978846, %v665_v39  ;;  %1120 = vmatpush.bf16.msra.mxu3 %v1604_v22  ;;  %v1573_v39 = vld [vmem:[#allocation2 + $0x1bc] sm:$0xf0]  ;;  %1094 = vmatpush.bf16.msrb.mxu1 %v1572_v37 }
 0x17c   : > { %1830 = vtanh.f32 %v668_v40  ;;  %v1579_v40 = vld [vmem:[#allocation2 + $0x1b8] sm:$0xf] }
 0x17d   : > { %1832 = vtanh.f32 %v667_v41  ;;  %v1576_v41 = vor.u32 %v1731_v38, %v1573_v39 }
 0x182   : > { %v1831_v42 = vpop.eup %1830 }
 0x183   : > { %v1833_v43 = vpop.eup %1832  ;;  %v672_v44 = vadd.f32 1.0, %v1831_v42  ;;  %v1733_v42 = vld [vmem:[#allocation2 + $0x1c0] sm:$0xf0] }
 0x184   : > { %v671_v45 = vadd.f32 1.0, %v1833_v43  ;;  %v1559_v43 = vld [vmem:[#allocation2 + $0x198] sm:$0xf] }
 0x185   : > { %v674_v46 = vmul.f32 0.5, %v672_v44  ;;  %v1729_v44 = vld [vmem:[#allocation2 + $0x1a0] sm:$0xf0] }
 0x186   : > { %v673_v47 = vmul.f32 0.5, %v671_v45  ;;  %v1560_v52 = vor.u32 %v1729_v44, %v1559_v43  ;;  %v1752_v43 = vld [vmem:[#allocation5 + $0x18] sm:$0xff]  ;;  %v1751_v44 = vld [vmem:[#allocation5 + $0x10] sm:$0xff] }
 0x187   : > { %v676_v48 = vmul.f32 %v674_v46, %v658_v28  ;;  %v1585_v28 = vld [vmem:[#allocation2 + $0x1d4] sm:$0xf0]  ;;  %v1580_v46 = vor.u32 %v1733_v42, %v1579_v40  ;;  %v1753_v42 = vld [vmem:[#allocation5 + $0x20] sm:$0xff] }
 0x188   : > { %v675_v49 = vmul.f32 %v673_v47, %v657_v29  ;;  %v1591_v29 = vld [vmem:[#allocation2 + $0x1d0] sm:$0xf]  ;;  %v1588_v31 = vor.u32 %v1734_v26, %v1585_v28  ;;  %v1728_v47 = vld [vmem:[#allocation2 + $0x19c] sm:$0xf]  ;;  %1095 = vmatpush.bf16.msrb.mxu1 %v1560_v52 }
 0x189   : > { %v1592_v35 = vor.u32 %v1736_v32, %v1591_v29 }
 0x18a   : > { %v677_v50 = vpack.c.bf16 %v676_v48, %v675_v49  ;;  %1107 = vmatpush.bf16.msra.mxu2 %v1588_v31  ;;  %v1561_v48 = vld [vmem:[#allocation2 + $0x1a4] sm:$0xf0] }
 0x18b   : > { %1121 = vmatpush.bf16.msra.mxu3 %v1592_v35  ;;  %v1564_v54 = vor.u32 %v1728_v47, %v1561_v48 }
 0x18c   : > { %847 = vmatmul.bf16.vlgmr.msrb.gmra.mxu2 %v677_v50  ;;  %861 = vmatmul.bf16.vlgmr.msrb.gmra.mxu3 %v677_v50 }
 0x18d   : > { %875 = vmatmul.bf16.vlgmr.msrb.gmra.mxu0 %v677_v50  ;;  %v1567_v50 = vld [vmem:[#allocation2 + $0x1a0] sm:$0xf]  ;;  %1096 = vmatpush.bf16.msrb.mxu1 %v1548_v63 }
 0x18e   : > { %1108 = vmatpush.bf16.msra.mxu2 %v1576_v41  ;;  %v1568_v57 = vor.u32 %v1730_v51, %v1567_v50  ;;  %v1824_v51 = vld [vmem:[%s2195_s3 + $0x3] ss:$0 sm:$0xff] }
 0x18f   : > { %1122 = vmatpush.bf16.msra.mxu3 %v1580_v46  ;;  %v1749_v46 = vld [vmem:[#allocation5] sm:$0xff] }
 0x192   : > { %1109 = vmatpush.bf16.msra.mxu2 %v1564_v54 }
 0x193   : > { %1123 = vmatpush.bf16.msra.mxu3 %v1568_v57 }
 0x196   : > { %1110 = vmatpush.bf16.msra.mxu2 %v1552_v0 }
 0x197   : > { %1124 = vmatpush.bf16.msra.mxu3 %v1556_v3 }
 0x20a   : > { %v2137_v23 = vpop.f32.mrf.mxu0 }
 0x20b   : > { %v892_v1 = vrot.slane %v2137_v23, 4  ;;  %v1754_v23 = vld [vmem:[#allocation5 + $0x28] sm:$0xff] }
 0x20c   : > { %1221 = vmatpush.bf16.msra.mxu0 %v1754_v23 }
 0x20f   : > { %v848_v45 = vpop.f32.mrf.mxu2  ;;  %v862_v49 = vpop.f32.mrf.mxu3 }
 0x210   : > { %v883_v4 = vrot.slane %v848_v45, 4  ;;  %1222 = vmatpush.bf16.msra.mxu0 %v1753_v42  ;;  %v1750_v45 = vld [vmem:[#allocation5 + $0x8] sm:$0xff] }
 0x212   : > { %v878_v53 = vpop.f32.mrf.mxu0 }
 0x213   : > { %v893_v62 = vrot.slane %v878_v53, 4 }
 0x214   : > { %1223 = vmatpush.bf16.msra.mxu0 %v1752_v43 }
 0x215   : > { %v895_v6 = vsel %vm885_vm10, %v893_v62, %v892_v1  ;;  %v894_v15 = vsel %vm885_vm10, %v892_v1, %v893_v62 }
 0x216   : > { %v897_v13 = vsel %vm891_vm12, %v895_v6, 0.0 }
 0x217   : > { %v850_v2 = vpop.f32.mrf.mxu2  ;;  %v864_v8 = vpop.f32.mrf.mxu3 }
 0x218   : > { %v884_v5 = vrot.slane %v850_v2, 4  ;;  %1224 = vmatpush.bf16.msra.mxu0 %v1751_v44 }
 0x21a   : > { %v887_v7 = vsel %vm885_vm10, %v884_v5, %v883_v4  ;;  %v886_v9 = vsel %vm885_vm10, %v883_v4, %v884_v5 }
 0x21b   : > { %v888_v10 = vsel %vm881_vm11, %v887_v7, 0.0  ;;  %v899_v11 = vadd.f32 %v886_v9, %v864_v8 }
 0x21c   : > { %v898_v30 = vadd.f32 %v888_v10, %v862_v49  ;;  %1225 = vmatpush.bf16.msra.mxu0 %v1750_v45 }
 0x21d   : > { %v901_v16 = vadd.f32 %v899_v11, %v897_v13 }
 0x21e   : > { %v900_v17 = vadd.f32 %v898_v30, %v894_v15 }
 0x21f   : > { %v908_v19 = vadd.f32 %v1823_v12, %v901_v16 }
 0x220   : > { %v907_v20 = vadd.f32 %v1823_v12, %v900_v17  ;;  %1226 = vmatpush.bf16.msra.mxu0 %v1749_v46 }
 0x221   : > { %v910_v21 = vmul.f32 %v908_v19, %v908_v19 }
 0x222   : > { %v909_v22 = vmul.f32 %v907_v20, %v907_v20 }
 0x223   : > { %v912_v24 = vmul.f32 %v910_v21, %v908_v19 }
 0x224   : > { %v911_v25 = vmul.f32 %v909_v22, %v907_v20 }
 0x225   : > { %v914_v26 = vmul.f32 0.044715, %v912_v24 }
 0x226   : > { %v913_v27 = vmul.f32 0.044715, %v911_v25 }
 0x227   : > { %v916_v28 = vadd.f32 %v914_v26, %v908_v19 }
 0x228   : > { %v915_v29 = vadd.f32 %v913_v27, %v907_v20 }
 0x229   : > { %v918_v31 = vmul.f32 0.7978846, %v916_v28 }
 0x22a   : > { %v917_v36 = vmul.f32 0.7978846, %v915_v29 }
 0x22b   : > { %1834 = vtanh.f32 %v918_v31 }
 0x22c   : > { %1836 = vtanh.f32 %v917_v36 }
 0x231   : > { %v1835_v32 = vpop.eup %1834 }
 0x232   : > { %v1837_v33 = vpop.eup %1836  ;;  %v922_v34 = vadd.f32 1.0, %v1835_v32 }
 0x233   : > { %v921_v35 = vadd.f32 1.0, %v1837_v33 }
 0x234   : > { %v924_v37 = vmul.f32 0.5, %v922_v34 }
 0x235   : > { %v923_v38 = vmul.f32 0.5, %v921_v35 }
 0x236   : > { %v926_v39 = vmul.f32 %v924_v37, %v908_v19 }
 0x237   : > { %v925_v40 = vmul.f32 %v923_v38, %v907_v20 }
 0x239   : > { %v927_v41 = vpack.c.bf16 %v926_v39, %v925_v40 }
 0x23b   : > { %1097 = vmatmul.bf16.vlgmr.msrb.gmra.mxu1 %v927_v41  ;;  %1111 = vmatmul.bf16.vlgmr.msra.gmra.mxu2 %v927_v41 }
 0x23c   : > { %1125 = vmatmul.bf16.vlgmr.msra.gmra.mxu3 %v927_v41 }
 0x2b8   : > { %v1098_v47 = vpop.f32.mrf.mxu1 }
 0x2be   : > { %v1112_v48 = vpop.f32.mrf.mxu2 }
 0x2bf   : > { %v1126_v49 = vpop.f32.mrf.mxu3 }
 0x2c0   : > { %v1100_v50 = vpop.f32.mrf.mxu1 }
 0x2c6   : > { %v1114_v52 = vpop.f32.mrf.mxu2 }
 0x2c7   : > { %v1140_v53 = vadd.f32 %v1114_v52, %v1098_v47  ;;  %v1128_v54 = vpop.f32.mrf.mxu3 }
 0x2c8   : > { %v1141_v55 = vadd.f32 %v1128_v54, %v1112_v48 }
 0x2c9   : > { %v1149_v56 = vadd.f32 %v1824_v51, %v1140_v53 }
 0x2ca   : > { %v1148_v57 = vadd.f32 %v1824_v51, %v1141_v55 }
 0x2cc   : > { %v1150_v58 = vpack.c.bf16 %v1149_v56, %v1148_v57 }
 0x2ce   : > { %1227 = vmatmul.bf16.vlgmr.msra.gmra.mxu0 %v1150_v58 }
 0x34b   : > { %v1228_v59 = vpop.f32.mrf.mxu0 }
 0x34c   : > { %v1229_v62 = vadd.f32 %v1825_v60, %v1228_v59 }
 0x353   : > { %v1230_v61 = vpop.f32.mrf.mxu0 }
 0x354   : > { %v1231_v63 = vadd.f32 %v1825_v60, %v1230_v61 }
 0x356   : > { %v1233_v0 = vmax.f32 %v1229_v62, %v1231_v63 }
 0x358   : > { %v1234_v1 = vrot.slane %v1233_v0, 4 }
 0x35a   : > { %v1235_v2 = vmax.f32 %v1233_v0, %v1234_v1 }
 0x35c   : > { %v1236_v3 = vrot.slane %v1235_v2, 2 }
 0x35e   : > { %v1237_v4 = vmax.f32 %v1235_v2, %v1236_v3 }
 0x360   : > { %v1238_v5 = vrot.slane %v1237_v4, 1 }
 0x362   : > { %v1239_v6 = vmax.f32 %v1237_v4, %v1238_v5 }
 0x364   : > { %1241 = vst.msk [vmem:[%s277_s17] sm:$0x1] %vm1240_vm13, %v1239_v6 }
 0x365   : > { %1925 = shalt.err (!%p1922_p8)
}
 0x366   : > { %1765 = dma.vmem_to_hbm [thread:$0]  (%p2049_p5), %s1254_s18, 16, %s1256_s19, %s1243_s20  }
 0x367 PF: > { %p1782_p9 = scmp.ge.s32.totalorder %s1968_s24, 2  ;;  %s1267_s9 = sand.u32 1, %s1956_s21  }
 0x368   : > { %s1268_s13 = scalar_lea.sflag [#allocation4], %s1267_s9 }
 0x369   : > { %p1775_p10 = pnand %p1782_p9, %p2053_p6 }
 0x36b   : > { %p1776_p11 = pneg %p1775_p10 }
 0x36d   : > { %1951 = dma.done.wait (%p1776_p11), %s1268_s13, 16  }
 0x36e   : > { %1953 = vsyncadd (%p1776_p11), %s1268_s13, 4294967280  ;;  %p18_p12 = scmp.ge.s32.totalorder %s2036_s27, 4   ;;  %s2202_s21 = smov %s1960_s22 }
 0x36f   : > { %s2203_s22 = smov %s1964_s23  ;;  %s2204_s23 = smov %s2047_s30 }
 0x370   : > { %s2205_s24 = smov %s2036_s27  ;;  %20 = sbr.rel (!%p18_p12) target bundleno = 5 (0x5), region = 94 }
 0x375   :  { %1273 = vsyncpa [#allocation3], 1 }
 0x376   :  { %1275 = vsyncpa [#allocation3 + $0x1], 1 }
 0x377   :  { %1276 = vsyncpa [#allocation6], 1 }
 0x378   :  { %1277 = vsyncpa [#allocation4], 1 }
 0x379   :  { %1279 = vsyncpa [#allocation4 + $0x1], 1 }

</bundles_post_ra>
